<compile_context>
chip_gen: v5e
topology: v5e:2x2
jax: 0.10.0
libtpu: 0.0.40
codegen_flags: <defaults>
</compile_context>

<pallas_src>
import functools

import jax
import jax.numpy as jnp
from jax.experimental import pallas as pl
from jax.experimental.pallas import tpu as pltpu

LEAKY_SLOPE = 0.2
DROPOUT_RATE = 0.3


def discriminator_kernel(x_ref,
                         w1_ref, b1_ref,
                         w2_ref, b2_ref,
                         w3_ref, b3_ref,
                         w4_ref, b4_ref,
                         m1_ref, m2_ref, m3_ref,
                         out_ref):
    x = x_ref[...]

    # fc1 -> leaky_relu(0.2) -> dropout(0.3)
    # Masks are pre-scaled to {0, 1/keep_prob}, so dropout is a single multiply
    # fused behind the leaky-ReLU select.
    h = jnp.dot(x.astype(jnp.bfloat16), w1_ref[...],
                preferred_element_type=jnp.float32) + b1_ref[...]
    h = jnp.where(h > 0, h, LEAKY_SLOPE * h) * m1_ref[...]

    # fc2 -> leaky_relu(0.2) -> dropout(0.3)
    h = jnp.dot(h.astype(jnp.bfloat16), w2_ref[...],
                preferred_element_type=jnp.float32) + b2_ref[...]
    h = jnp.where(h > 0, h, LEAKY_SLOPE * h) * m2_ref[...]

    # fc3 -> leaky_relu(0.2) -> dropout(0.3)
    h = jnp.dot(h.astype(jnp.bfloat16), w3_ref[...],
                preferred_element_type=jnp.float32) + b3_ref[...]
    h = jnp.where(h > 0, h, LEAKY_SLOPE * h) * m3_ref[...]

    # fc4 (out_features == 1) -> sigmoid.
    # w4 is passed transposed as (1, hidden): VPU multiply + lane reduction
    # instead of a wasteful 1-column MXU pass.
    logit = jnp.sum(h * w4_ref[...], axis=-1, keepdims=True) + b4_ref[...]
    out_ref[...] = jax.nn.sigmoid(logit)


@jax.jit
def discriminator_forward(x, params, dropout_key):
    (w1, b1), (w2, b2), (w3, b3), (w4, b4) = params
    B, F = x.shape
    H1, H2, H3 = w1.shape[1], w2.shape[1], w3.shape[1]
    out_dim = w4.shape[1]
    assert out_dim == 1, "Discriminator head is a single logit"

    # Training-mode dropout masks (F.dropout default training=True), pre-scaled.
    keep_prob = 1.0 - DROPOUT_RATE
    k1, k2, k3 = jax.random.split(dropout_key, 3)
    inv_keep = jnp.float32(1.0 / keep_prob)
    m1 = jax.random.bernoulli(k1, keep_prob, (B, H1)).astype(jnp.float32) * inv_keep
    m2 = jax.random.bernoulli(k2, keep_prob, (B, H2)).astype(jnp.float32) * inv_keep
    m3 = jax.random.bernoulli(k3, keep_prob, (B, H3)).astype(jnp.float32) * inv_keep

    # bf16 matmul operands (f32 accumulation happens in the kernel).
    w1b, w2b, w3b = (w.astype(jnp.bfloat16) for w in (w1, w2, w3))
    w4t = w4.T.astype(jnp.float32)  # (1, H3) for the VPU reduce path

    # Batch tile: biggest practical tile; whole batch if it is small.
    TB = min(B, 256)
    n_tiles = pl.cdiv(B, TB)

    def row_spec(d):
        return pl.BlockSpec((TB, d), lambda i: (i, 0))

    def const_spec(shape):
        return pl.BlockSpec(shape, lambda i: (0, 0))

    flops = 2 * B * (F * H1 + H1 * H2 + H2 * H3 + H3)
    bytes_accessed = (
        x.size * 4
        + (w1.size + w2.size + w3.size) * 2 + w4.size * 4
        + (b1.size + b2.size + b3.size + b4.size) * 4
        + (m1.size + m2.size + m3.size) * 4
        + B * out_dim * 4
    )
    cost = pl.CostEstimate(flops=flops, transcendentals=B,
                           bytes_accessed=bytes_accessed)

    return pl.pallas_call(
        discriminator_kernel,
        out_shape=jax.ShapeDtypeStruct((B, out_dim), jnp.float32),
        grid=(n_tiles,),
        in_specs=[
            row_spec(F),
            const_spec(w1b.shape), const_spec(b1.shape),
            const_spec(w2b.shape), const_spec(b2.shape),
            const_spec(w3b.shape), const_spec(b3.shape),
            const_spec(w4t.shape), const_spec(b4.shape),
            row_spec(H1), row_spec(H2), row_spec(H3),
        ],
        out_specs=row_spec(out_dim),
        compiler_params=pltpu.CompilerParams(
            dimension_semantics=("parallel",)),
        cost_estimate=cost,
    )(x, w1b, b1, w2b, b2, w3b, b3, w4t, b4, m1, m2, m3)


def init_params(key, input_size, hidden_dim, output_size):
    """PyTorch nn.Linear-style init: uniform(-1/sqrt(fan_in), 1/sqrt(fan_in)).
    Weights stored as (in_features, out_features) so the kernel does x @ W + b."""
    dims = [input_size, hidden_dim * 4, hidden_dim * 2, hidden_dim, output_size]
    params = []
    for i in range(4):
        fan_in, fan_out = dims[i], dims[i + 1]
        key, kw, kb = jax.random.split(key, 3)
        bound = 1.0 / jnp.sqrt(jnp.float32(fan_in))
        w = jax.random.uniform(kw, (fan_in, fan_out), jnp.float32, -bound, bound)
        b = jax.random.uniform(kb, (1, fan_out), jnp.float32, -bound, bound)
        params.append((w, b))
    return params


if __name__ == "__main__":
    key = jax.random.PRNGKey(0)
    key, kx, kdrop = jax.random.split(key, 3)

    batch = 8
    input_size = 32
    hidden_dim = 32
    output_size = 1

    x = jax.random.normal(kx, (batch, input_size), jnp.float32)
    params = init_params(key, input_size, hidden_dim, output_size)

    out = discriminator_forward(x, params, kdrop)
    out = jax.block_until_ready(out)

    assert out.shape == (batch, output_size)
    assert bool(jnp.all(jnp.isfinite(out)))
    assert bool(jnp.all((out >= 0.0) & (out <= 1.0)))
    print("KERNEL_OK")
</pallas_src>

<mosaic_0001>
module attributes {stable_mosaic.version = 11 : i64} {
  func.func @discriminator_kernel(%arg0: i32, %arg1: memref<8x32xf32, #tpu.memory_space<vmem>>, %arg2: memref<32x128xbf16, #tpu.memory_space<vmem>>, %arg3: memref<1x128xf32, #tpu.memory_space<vmem>>, %arg4: memref<128x64xbf16, #tpu.memory_space<vmem>>, %arg5: memref<1x64xf32, #tpu.memory_space<vmem>>, %arg6: memref<64x32xbf16, #tpu.memory_space<vmem>>, %arg7: memref<1x32xf32, #tpu.memory_space<vmem>>, %arg8: memref<1x32xf32, #tpu.memory_space<vmem>>, %arg9: memref<1x1xf32, #tpu.memory_space<vmem>>, %arg10: memref<8x128xf32, #tpu.memory_space<vmem>>, %arg11: memref<8x64xf32, #tpu.memory_space<vmem>>, %arg12: memref<8x32xf32, #tpu.memory_space<vmem>>, %arg13: memref<8x1xf32, #tpu.memory_space<vmem>>) attributes {dimension_semantics = [#tpu.dimension_semantics<parallel>], iteration_bounds = array<i64: 1>, scalar_prefetch = 0 : i64, scratch_operands = 0 : i64, tpu.core_type = #tpu.core_type<tc>, window_params = [{transform_indices = @transform_0, window_bounds = array<i64: 8, 32>}, {pipeline_mode = #tpu.pipeline_mode<synchronous>, transform_indices = @transform_1, window_bounds = array<i64: 32, 128>}, {pipeline_mode = #tpu.pipeline_mode<synchronous>, transform_indices = @transform_2, window_bounds = array<i64: 1, 128>}, {pipeline_mode = #tpu.pipeline_mode<synchronous>, transform_indices = @transform_3, window_bounds = array<i64: 128, 64>}, {pipeline_mode = #tpu.pipeline_mode<synchronous>, transform_indices = @transform_4, window_bounds = array<i64: 1, 64>}, {pipeline_mode = #tpu.pipeline_mode<synchronous>, transform_indices = @transform_5, window_bounds = array<i64: 64, 32>}, {pipeline_mode = #tpu.pipeline_mode<synchronous>, transform_indices = @transform_6, window_bounds = array<i64: 1, 32>}, {pipeline_mode = #tpu.pipeline_mode<synchronous>, transform_indices = @transform_7, window_bounds = array<i64: 1, 32>}, {pipeline_mode = #tpu.pipeline_mode<synchronous>, transform_indices = @transform_8, window_bounds = array<i64: 1, 1>}, {transform_indices = @transform_9, window_bounds = array<i64: 8, 128>}, {transform_indices = @transform_10, window_bounds = array<i64: 8, 64>}, {transform_indices = @transform_11, window_bounds = array<i64: 8, 32>}, {transform_indices = @transform_12, window_bounds = array<i64: 8, 1>}]} {
    %c0 = arith.constant 0 : index
    %c0_0 = arith.constant 0 : index
    %0 = vector.load %arg1[%c0, %c0_0] : memref<8x32xf32, #tpu.memory_space<vmem>>, vector<8x32xf32>
    %1 = arith.truncf %0 : vector<8x32xf32> to vector<8x32xbf16>
    %c0_1 = arith.constant 0 : index
    %c0_2 = arith.constant 0 : index
    %2 = vector.load %arg2[%c0_1, %c0_2] : memref<32x128xbf16, #tpu.memory_space<vmem>>, vector<32x128xbf16>
    %cst = arith.constant dense<0.000000e+00> : vector<8x128xf32>
    %3 = tpu.matmul %1, %2, %cst {dimension_numbers = #tpu.dot_dimension_numbers<[1], [0], [0], [1], [0, 0, 1, 1], [], []>} : vector<8x32xbf16>, vector<32x128xbf16>, vector<8x128xf32> -> vector<8x128xf32>
    %c0_3 = arith.constant 0 : index
    %c0_4 = arith.constant 0 : index
    %4 = vector.load %arg3[%c0_3, %c0_4] : memref<1x128xf32, #tpu.memory_space<vmem>>, vector<1x128xf32>
    %5 = vector.broadcast %4 : vector<1x128xf32> to vector<8x128xf32>
    %6 = arith.addf %3, %5 : vector<8x128xf32>
    %cst_5 = arith.constant 0.000000e+00 : f32
    %7 = vector.broadcast %cst_5 : f32 to vector<8x128xf32>
    %8 = arith.cmpf ogt, %6, %7 : vector<8x128xf32>
    %cst_6 = arith.constant 2.000000e-01 : f32
    %9 = vector.broadcast %cst_6 : f32 to vector<8x128xf32>
    %10 = arith.mulf %9, %6 : vector<8x128xf32>
    %11 = arith.select %8, %6, %10 : vector<8x128xi1>, vector<8x128xf32>
    %c0_7 = arith.constant 0 : index
    %c0_8 = arith.constant 0 : index
    %12 = vector.load %arg10[%c0_7, %c0_8] : memref<8x128xf32, #tpu.memory_space<vmem>>, vector<8x128xf32>
    %13 = arith.mulf %11, %12 : vector<8x128xf32>
    %14 = arith.truncf %13 : vector<8x128xf32> to vector<8x128xbf16>
    %c0_9 = arith.constant 0 : index
    %c0_10 = arith.constant 0 : index
    %15 = vector.load %arg4[%c0_9, %c0_10] : memref<128x64xbf16, #tpu.memory_space<vmem>>, vector<128x64xbf16>
    %cst_11 = arith.constant dense<0.000000e+00> : vector<8x64xf32>
    %16 = tpu.matmul %14, %15, %cst_11 {dimension_numbers = #tpu.dot_dimension_numbers<[1], [0], [0], [1], [0, 0, 1, 1], [], []>} : vector<8x128xbf16>, vector<128x64xbf16>, vector<8x64xf32> -> vector<8x64xf32>
    %c0_12 = arith.constant 0 : index
    %c0_13 = arith.constant 0 : index
    %17 = vector.load %arg5[%c0_12, %c0_13] : memref<1x64xf32, #tpu.memory_space<vmem>>, vector<1x64xf32>
    %18 = vector.broadcast %17 : vector<1x64xf32> to vector<8x64xf32>
    %19 = arith.addf %16, %18 : vector<8x64xf32>
    %cst_14 = arith.constant 0.000000e+00 : f32
    %20 = vector.broadcast %cst_14 : f32 to vector<8x64xf32>
    %21 = arith.cmpf ogt, %19, %20 : vector<8x64xf32>
    %cst_15 = arith.constant 2.000000e-01 : f32
    %22 = vector.broadcast %cst_15 : f32 to vector<8x64xf32>
    %23 = arith.mulf %22, %19 : vector<8x64xf32>
    %24 = arith.select %21, %19, %23 : vector<8x64xi1>, vector<8x64xf32>
    %c0_16 = arith.constant 0 : index
    %c0_17 = arith.constant 0 : index
    %25 = vector.load %arg11[%c0_16, %c0_17] : memref<8x64xf32, #tpu.memory_space<vmem>>, vector<8x64xf32>
    %26 = arith.mulf %24, %25 : vector<8x64xf32>
    %27 = arith.truncf %26 : vector<8x64xf32> to vector<8x64xbf16>
    %c0_18 = arith.constant 0 : index
    %c0_19 = arith.constant 0 : index
    %28 = vector.load %arg6[%c0_18, %c0_19] : memref<64x32xbf16, #tpu.memory_space<vmem>>, vector<64x32xbf16>
    %cst_20 = arith.constant dense<0.000000e+00> : vector<8x32xf32>
    %29 = tpu.matmul %27, %28, %cst_20 {dimension_numbers = #tpu.dot_dimension_numbers<[1], [0], [0], [1], [0, 0, 1, 1], [], []>} : vector<8x64xbf16>, vector<64x32xbf16>, vector<8x32xf32> -> vector<8x32xf32>
    %c0_21 = arith.constant 0 : index
    %c0_22 = arith.constant 0 : index
    %30 = vector.load %arg7[%c0_21, %c0_22] : memref<1x32xf32, #tpu.memory_space<vmem>>, vector<1x32xf32>
    %31 = vector.broadcast %30 : vector<1x32xf32> to vector<8x32xf32>
    %32 = arith.addf %29, %31 : vector<8x32xf32>
    %cst_23 = arith.constant 0.000000e+00 : f32
    %33 = vector.broadcast %cst_23 : f32 to vector<8x32xf32>
    %34 = arith.cmpf ogt, %32, %33 : vector<8x32xf32>
    %cst_24 = arith.constant 2.000000e-01 : f32
    %35 = vector.broadcast %cst_24 : f32 to vector<8x32xf32>
    %36 = arith.mulf %35, %32 : vector<8x32xf32>
    %37 = arith.select %34, %32, %36 : vector<8x32xi1>, vector<8x32xf32>
    %c0_25 = arith.constant 0 : index
    %c0_26 = arith.constant 0 : index
    %38 = vector.load %arg12[%c0_25, %c0_26] : memref<8x32xf32, #tpu.memory_space<vmem>>, vector<8x32xf32>
    %39 = arith.mulf %37, %38 : vector<8x32xf32>
    %c0_27 = arith.constant 0 : index
    %c0_28 = arith.constant 0 : index
    %40 = vector.load %arg8[%c0_27, %c0_28] : memref<1x32xf32, #tpu.memory_space<vmem>>, vector<1x32xf32>
    %41 = vector.broadcast %40 : vector<1x32xf32> to vector<8x32xf32>
    %42 = arith.mulf %39, %41 : vector<8x32xf32>
    %cst_29 = arith.constant dense<0.000000e+00> : vector<8xf32>
    %43 = vector.multi_reduction <add>, %42, %cst_29 [1] : vector<8x32xf32> to vector<8xf32>
    %44 = vector.shape_cast %43 : vector<8xf32> to vector<8x1xf32>
    %c0_30 = arith.constant 0 : index
    %c0_31 = arith.constant 0 : index
    %45 = vector.load %arg9[%c0_30, %c0_31] : memref<1x1xf32, #tpu.memory_space<vmem>>, vector<1x1xf32>
    %46 = vector.broadcast %45 : vector<1x1xf32> to vector<8x1xf32>
    %47 = arith.addf %44, %46 : vector<8x1xf32>
    %48 = arith.negf %47 : vector<8x1xf32>
    %49 = math.exp %48 : vector<8x1xf32>
    %cst_32 = arith.constant 1.000000e+00 : f32
    %50 = vector.broadcast %cst_32 : f32 to vector<8x1xf32>
    %51 = arith.addf %50, %49 : vector<8x1xf32>
    %52 = arith.divf %50, %51 : vector<8x1xf32>
    %c0_33 = arith.constant 0 : index
    %c0_34 = arith.constant 0 : index
    %53 = vector.load %arg13[%c0_33, %c0_34] : memref<8x1xf32, #tpu.memory_space<vmem>>, vector<8x1xf32>
    tpu.vector_store %arg13[%c0_33, %c0_34], %52 {strides = array<i32>} : memref<8x1xf32, #tpu.memory_space<vmem>>, vector<8x1xf32>,
    return
  }
  func.func @transform_0(%arg0: i32) -> (i32, i32) {
    %c0_i32 = arith.constant 0 : i32
    %c0_i32_0 = arith.constant 0 : i32
    return %arg0, %c0_i32 : i32, i32
  }
  func.func @transform_1(%arg0: i32) -> (i32, i32) {
    %c0_i32 = arith.constant 0 : i32
    %c0_i32_0 = arith.constant 0 : i32
    %c0_i32_1 = arith.constant 0 : i32
    return %c0_i32, %c0_i32_0 : i32, i32
  }
  func.func @transform_2(%arg0: i32) -> (i32, i32) {
    %c0_i32 = arith.constant 0 : i32
    %c0_i32_0 = arith.constant 0 : i32
    %c0_i32_1 = arith.constant 0 : i32
    return %c0_i32, %c0_i32_0 : i32, i32
  }
  func.func @transform_3(%arg0: i32) -> (i32, i32) {
    %c0_i32 = arith.constant 0 : i32
    %c0_i32_0 = arith.constant 0 : i32
    %c0_i32_1 = arith.constant 0 : i32
    return %c0_i32, %c0_i32_0 : i32, i32
  }
  func.func @transform_4(%arg0: i32) -> (i32, i32) {
    %c0_i32 = arith.constant 0 : i32
    %c0_i32_0 = arith.constant 0 : i32
    %c0_i32_1 = arith.constant 0 : i32
    return %c0_i32, %c0_i32_0 : i32, i32
  }
  func.func @transform_5(%arg0: i32) -> (i32, i32) {
    %c0_i32 = arith.constant 0 : i32
    %c0_i32_0 = arith.constant 0 : i32
    %c0_i32_1 = arith.constant 0 : i32
    return %c0_i32, %c0_i32_0 : i32, i32
  }
  func.func @transform_6(%arg0: i32) -> (i32, i32) {
    %c0_i32 = arith.constant 0 : i32
    %c0_i32_0 = arith.constant 0 : i32
    %c0_i32_1 = arith.constant 0 : i32
    return %c0_i32, %c0_i32_0 : i32, i32
  }
  func.func @transform_7(%arg0: i32) -> (i32, i32) {
    %c0_i32 = arith.constant 0 : i32
    %c0_i32_0 = arith.constant 0 : i32
    %c0_i32_1 = arith.constant 0 : i32
    return %c0_i32, %c0_i32_0 : i32, i32
  }
  func.func @transform_8(%arg0: i32) -> (i32, i32) {
    %c0_i32 = arith.constant 0 : i32
    %c0_i32_0 = arith.constant 0 : i32
    %c0_i32_1 = arith.constant 0 : i32
    return %c0_i32, %c0_i32_0 : i32, i32
  }
  func.func @transform_9(%arg0: i32) -> (i32, i32) {
    %c0_i32 = arith.constant 0 : i32
    %c0_i32_0 = arith.constant 0 : i32
    return %arg0, %c0_i32 : i32, i32
  }
  func.func @transform_10(%arg0: i32) -> (i32, i32) {
    %c0_i32 = arith.constant 0 : i32
    %c0_i32_0 = arith.constant 0 : i32
    return %arg0, %c0_i32 : i32, i32
  }
  func.func @transform_11(%arg0: i32) -> (i32, i32) {
    %c0_i32 = arith.constant 0 : i32
    %c0_i32_0 = arith.constant 0 : i32
    return %arg0, %c0_i32 : i32, i32
  }
  func.func @transform_12(%arg0: i32) -> (i32, i32) {
    %c0_i32 = arith.constant 0 : i32
    %c0_i32_0 = arith.constant 0 : i32
    return %arg0, %c0_i32 : i32, i32
  }
}

</mosaic_0001>

<bundles_post_ra>
// kernel: discriminator_forward.3
= control target key start
LH: loop header
LB: loop body
LE: loop exit
PB: predicated region body
PF: predicated region fallthrough
CT: control target
= control target key end

     0   :  { %vm66_vm0 = vcmask 261120   ;;  %vm212_vm3 = vcmask 523264   ;;  %vm266_vm8 = vcmask 7168   ;;  %s493_s1 = inlined_call_operand.vmem [shape: bf16[32,128], index: 1, kind: input, shape index: {}]   ;;  %s494_s0 = inlined_call_operand.vmem [shape: f32[8,32], index: 0, kind: input, shape index: {}]   ;;  %s495_s3 = inlined_call_operand.vmem [shape: bf16[128,64], index: 3, kind: input, shape index: {}]   ;;  %s496_s2 = inlined_call_operand.vmem [shape: f32[1,128], index: 2, kind: input, shape index: {}]   ;;  %s497_s4 = inlined_call_operand.vmem [shape: f32[1,64], index: 4, kind: input, shape index: {}]   ;;  %s498_s5 = inlined_call_operand.vmem [shape: bf16[64,32], index: 5, kind: input, shape index: {}]   ;;  %s499_s9 = inlined_call_operand.vmem [shape: f32[8,128], index: 9, kind: input, shape index: {}]   ;;  %s500_s6 = inlined_call_operand.vmem [shape: f32[1,32], index: 6, kind: input, shape index: {}]   ;;  %s501_s10 = inlined_call_operand.vmem [shape: f32[8,64], index: 10, kind: input, shape index: {}]   ;;  %s502_s7 = inlined_call_operand.vmem [shape: f32[1,32], index: 7, kind: input, shape index: {}]   ;;  %s503_s8 = inlined_call_operand.<no memory space> [shape: f32[1,1], index: 8, kind: input, shape index: {}]   ;;  %s504_s11 = inlined_call_operand.vmem [shape: f32[8,32], index: 11, kind: input, shape index: {}]   ;;  %s505_s12 = inlined_call_operand.vmem [shape: f32[8,1], index: 12, kind: output, shape index: {}]  }
   0x1   :  { %v332_v0 = vld [vmem:[%s493_s1 + $0x8] sm:$0xff]  ;;  %v340_v1 = vld [vmem:[%s495_s3 + $0x38] sm:$0xff]  ;;  %v331_v2 = vld [vmem:[%s493_s1] sm:$0xff]  ;;  %v17_v34 = vstv %s503_s8 }
   0x2   :  { %76 = vmatpush.bf16.msra.mxu0 %v332_v0  ;;  %v44_v3 = vld [vmem:[%s494_s0] sm:$0xff]  ;;  %157 = vmatpush.bf16.msra.mxu1 %v340_v1  ;;  %v339_v4 = vld [vmem:[%s495_s3 + $0x30] sm:$0xff]  ;;  %v338_v6 = vld [vmem:[%s495_s3 + $0x28] sm:$0xff]  ;;  %18 = vst [vmem:[#allocation2] sm:$0x1] %v17_v34 }
   0x3   :  { %v45_v5 = vpack.c.bf16 %v44_v3, %v44_v3  ;;  %v337_v7 = vld [vmem:[%s495_s3 + $0x20] sm:$0xff]  ;;  %v336_v8 = vld [vmem:[%s495_s3 + $0x18] sm:$0xff]  ;;  %v335_v9 = vld [vmem:[%s495_s3 + $0x10] sm:$0xff] }
   0x4   :  { %v334_v10 = vld [vmem:[%s495_s3 + $0x8] sm:$0xff]  ;;  %v333_v11 = vld [vmem:[%s495_s3] sm:$0xff]  ;;  %v344_v12 = vld [vmem:[%s498_s5 + $0x18] sm:$0xff] }
   0x5   :  { %220 = vmatpush.bf16.msra.mxu2 %v344_v12  ;;  %v343_v13 = vld [vmem:[%s498_s5 + $0x10] sm:$0xff]  ;;  %v345_v14 = vld [vmem:[%s496_s2] ss:$0 sm:$0xff]  ;;  %v342_v23 = vld [vmem:[%s498_s5 + $0x8] sm:$0xff] }
   0x6   :  { %77 = vmatpush.bf16.msra.mxu0 %v331_v2  ;;  %158 = vmatpush.bf16.msra.mxu1 %v339_v4  ;;  %v86_v18 = vld [vmem:[%s499_s9] sm:$0xff] }
   0x7   :  { %v341_v24 = vld [vmem:[%s498_s5] sm:$0xff] }
   0x8   :  { %v346_v25 = vld [vmem:[%s497_s4] ss:$0 sm:$0xff] }
   0x9   :  { %280 = vmatmul.msk.bf16.vlgmr.msra.gmra.mxu0 %vm66_vm0, %v45_v5  ;;  %221 = vmatpush.bf16.msra.mxu2 %v343_v13  ;;  %v173_v29 = vld [vmem:[%s501_s10] sm:$0xff] }
   0xa   :  { %159 = vmatpush.bf16.msra.mxu1 %v338_v6  ;;  %v347_v35 = vld [vmem:[%s500_s6] ss:$0 sm:$0xff] }
   0xb   :  { %v232_v39 = vld [vmem:[%s504_s11] sm:$0xff] }
   0xc   :  { %v348_v40 = vld [vmem:[%s502_s7] ss:$0 sm:$0xff] }
   0xd   :  { %222 = vmatpush.bf16.msra.mxu2 %v342_v23  ;;  %v349_v46 = vld [vmem:[#allocation2] ss:$0 sm:$0xff] }
   0xe   :  { %160 = vmatpush.bf16.msra.mxu1 %v337_v7 }
  0x11   :  { %223 = vmatpush.bf16.msra.mxu2 %v341_v24 }
  0x12   :  { %161 = vmatpush.bf16.msra.mxu1 %v336_v8 }
  0x16   :  { %162 = vmatpush.bf16.msra.mxu1 %v335_v9 }
  0x1a   :  { %163 = vmatpush.bf16.msra.mxu1 %v334_v10 }
  0x1e   :  { %164 = vmatpush.bf16.msra.mxu1 %v333_v11 }
  0x86   :  { %v79_v15 = vpop.f32.mrf.mxu0 }
  0x87   :  { %v80_v16 = vadd.f32 %v345_v14, %v79_v15 }
  0x89   :  { %vm83_vm1 = vcmp.gt.f32.partialorder %v80_v16, 0.0  ;;  %v84_v17 = vmul.f32 0.2, %v80_v16 }
  0x8b   :  { %v85_v19 = vsel %vm83_vm1, %v80_v16, %v84_v17 }
  0x8c   :  { %v87_v20 = vmul.f32 %v86_v18, %v85_v19 }
  0x8e   :  { %v81_v21 = vpop.f32.mrf.mxu0  ;;  %v88_v22 = vpack.c.bf16 %v87_v20, %v87_v20 }
  0x90   :  { %165 = vmatmul.bf16.vlgmr.msra.gmra.mxu1 %v88_v22 }
 0x10d   :  { %v166_v26 = vpop.f32.mrf.mxu1 }
 0x10e   :  { %v167_v27 = vadd.f32 %v346_v25, %v166_v26 }
 0x110   :  { %vm170_vm2 = vcmp.gt.f32.partialorder %v167_v27, 0.0  ;;  %v171_v28 = vmul.f32 0.2, %v167_v27 }
 0x112   :  { %v172_v30 = vsel %vm170_vm2, %v167_v27, %v171_v28 }
 0x113   :  { %v174_v31 = vmul.f32 %v173_v29, %v172_v30 }
 0x115   :  { %v168_v32 = vpop.f32.mrf.mxu1  ;;  %v175_v33 = vpack.c.bf16 %v174_v31, %v174_v31 }
 0x117   :  { %329 = vmatmul.msk.bf16.vlgmr.msra.gmra.mxu2 %vm212_vm3, %v175_v33 }
 0x19a   :  { %v225_v36 = vpop.f32.mrf.mxu2 }
 0x19b   :  { %v226_v37 = vadd.f32 %v347_v35, %v225_v36 }
 0x19d   :  { %vm229_vm4 = vcmp.gt.f32.partialorder %v226_v37, 0.0  ;;  %v230_v38 = vmul.f32 0.2, %v226_v37 }
 0x19f   :  { %v231_v41 = vsel %vm229_vm4, %v226_v37, %v230_v38 }
 0x1a0   :  { %v233_v42 = vmul.f32 %v232_v39, %v231_v41 }
 0x1a2   :  { %v227_v43 = vpop.f32.mrf.mxu2  ;;  %v238_v44 = vmul.f32 %v348_v40, %v233_v42 }
 0x1a4   :  { %v239_v45 = vsel %vm66_vm0, %v238_v44, 0.0 }
 0x1a5   :  { %240 = vadd.xlane.f32.xlu0 %v239_v45 }
 0x218   :  { %v241_v47 = vpop.xlane.xlu0 %240 }
 0x219   :  { %v246_v48 = vadd.f32 %v349_v46, %v241_v47 }
 0x21b   :  { %v330_v49 = vmul.f32 -1.442695, %v246_v48 }
 0x21d   :  { %350 = vpow2.f32 %v330_v49 }
 0x223   :  { %v351_v50 = vpop.eup %350 }
 0x224   :  { %v250_v51 = vadd.f32 1.0, %v351_v50 }
 0x226   :  { %352 = vrcp.f32 %v250_v51  ;;  %v262_v55 = vand.u32 2147483648, %v250_v51  ;;  %v260_v57 = vand.u32 2147483647, %v250_v51  ;;  %vm256_vm6 = vweird.f32 %v250_v51 }
 0x228   :  { %v263_v59 = vor.u32 1.1754944e-38, %v262_v55  ;;  %vm261_vm9 = vcmp.eq.f32.partialorder %v260_v57, 8.507059e+37 }
 0x22c   :  { %v353_v52 = vpop.eup %352 }
 0x22d   :  { %v252_v53 = vmul.f32 %v353_v52, %v250_v51  ;;  %vm257_vm5 = vweird.f32 %v353_v52 }
 0x22e   :  { %vm258_vm7 = vmor %vm256_vm6, %vm257_vm5 }
 0x22f   :  { %v253_v54 = vsub.f32 1.0, %v252_v53 }
 0x231   :  { %v254_v56 = vmul.f32 %v353_v52, %v253_v54 }
 0x233   :  { %v255_v58 = vadd.f32 %v353_v52, %v254_v56 }
 0x235   :  { %v259_v60 = vsel %vm258_vm7, %v353_v52, %v255_v58 }
 0x236   :  { %v264_v61 = vsel %vm261_vm9, %v263_v59, %v259_v60 }
 0x237   :  { %267 = vst.msk [vmem:[%s505_s12] sm:$0xff] %vm266_vm8, %v264_v61 }

</bundles_post_ra>
